<compile_context>
chip_gen: v6e
topology: v6e:2x2x1
jax: 0.10.0
libtpu: 0.0.40
codegen_flags: <defaults>
</compile_context>

<pallas_src>
import math

import jax
import jax.numpy as jnp
from jax.experimental import pallas as pl
from jax.experimental.pallas import tpu as pltpu


# --------------------------------------------------------------------------- #
# Kernel
# --------------------------------------------------------------------------- #
def _make_kernel(*, n_rows, tile_n, K, x_size, d):
    Kx = K * x_size

    def kernel(xy_ref, w1_ref, b1_ref, floor_ref, w2_ref, b2_ref, g_ref, out_ref):
        i = pl.program_id(0)

        xy = xy_ref[...]                                            # (TN, x_size+d) f32

        # Fused FF layer 1 (+ identity passthrough of x). ReLU only on hidden columns:
        # floor = -FLT_MAX on the x columns, 0 on the hidden columns.
        h = jnp.dot(xy, w1_ref[...], preferred_element_type=jnp.float32)
        h = jnp.maximum(h + b1_ref[...], floor_ref[...])            # (TN, x_size+6d)

        # Fused FF layer 2 (block matrix): [diff | std_logits | w_logits]
        #   diff = x_rep - mu   (x@R and the subtract folded into the weight/bias)
        out2 = jnp.dot(h, w2_ref[...], preferred_element_type=jnp.float32) + b2_ref[...]
        diff = out2[:, :Kx]                                         # (TN, K*x_size)
        std_logits = out2[:, Kx:Kx + K]                             # (TN, K)
        w_logits = out2[:, Kx + K:]                                 # (TN, K)

        # ||x - mu_k||^2 via a constant 0/1 group-sum matmul (no 3-D reshape).
        sq = jnp.dot(diff * diff, g_ref[...],
                     preferred_element_type=jnp.float32)            # (TN, K)

        # std = exp(s)  =>  std^2 = exp(2s), d*log|std| = d*s  (no exp->log round trip)
        t = -0.5 * jnp.exp(2.0 * std_logits) * sq + d * std_logits + w_logits

        # Mask rows past the true batch size (ragged last tile) BEFORE any exp.
        row = jax.lax.broadcasted_iota(jnp.int32, t.shape, 0)
        valid = (i * tile_n + row) < n_rows
        t = jnp.where(valid, t, 0.0)
        wl = jnp.where(valid, w_logits, 0.0)

        # logsumexp_k(base_k + log_softmax_k(w)) == logsumexp_k(base_k + w_k) - logsumexp_k(w_k)
        tmax = jnp.max(t, axis=-1, keepdims=True)
        lse_t = tmax + jnp.log(jnp.sum(jnp.exp(t - tmax), axis=-1, keepdims=True))
        wmax = jnp.max(wl, axis=-1, keepdims=True)
        lse_w = wmax + jnp.log(jnp.sum(jnp.exp(wl - wmax), axis=-1, keepdims=True))
        lse = lse_t - lse_w                                         # (TN, 1); 0 on masked rows

        # Per-tile partial sum, written as a lane-dense (8,128) block (unmasked vst).
        psum = jnp.sum(lse, axis=0, keepdims=True)                  # (1, 1)
        out_ref[...] = jnp.zeros(out_ref.shape, jnp.float32) + psum

    return kernel


# --------------------------------------------------------------------------- #
# Parameter fusion (done once in the wrapper, outside the kernel)
# --------------------------------------------------------------------------- #
def fuse_params(params, *, x_size, K):
    """Fuse the three FF nets + the x-replication/subtract into two block matmuls."""
    (w1m, b1m, w2m, b2m), (w1s, b1s, w2s, b2s), (w1w, b1w, w2w, b2w) = params
    d = w1m.shape[0]
    h2 = w1m.shape[1]                       # 2*d
    H = 3 * h2                              # 6*d
    Kx = K * x_size

    # Layer 1: input concat(x, y) -> concat(x, h_mean, h_std, h_w)
    w1a = jnp.zeros((x_size + d, x_size + H), jnp.float32)
    w1a = w1a.at[:x_size, :x_size].set(jnp.eye(x_size, dtype=jnp.float32))
    w1a = w1a.at[x_size:, x_size + 0 * h2:x_size + 1 * h2].set(w1m)
    w1a = w1a.at[x_size:, x_size + 1 * h2:x_size + 2 * h2].set(w1s)
    w1a = w1a.at[x_size:, x_size + 2 * h2:x_size + 3 * h2].set(w1w)
    b1a = jnp.concatenate([jnp.zeros((1, x_size), jnp.float32), b1m, b1s, b1w], axis=1)
    # ReLU floor: pass x columns through (max with -FLT_MAX), ReLU on hidden columns.
    floor1 = jnp.concatenate(
        [jnp.full((1, x_size), -jnp.finfo(jnp.float32).max, jnp.float32),
         jnp.zeros((1, H), jnp.float32)], axis=1)

    # Layer 2: concat(x, h) -> [diff | std_logits | w_logits],  diff = x_rep - mu
    R = jnp.tile(jnp.eye(x_size, dtype=jnp.float32), (1, K))        # (x_size, Kx)
    w2a = jnp.zeros((x_size + H, Kx + 2 * K), jnp.float32)
    w2a = w2a.at[:x_size, :Kx].set(R)
    w2a = w2a.at[x_size + 0 * h2:x_size + 1 * h2, :Kx].set(-w2m)
    w2a = w2a.at[x_size + 1 * h2:x_size + 2 * h2, Kx:Kx + K].set(w2s)
    w2a = w2a.at[x_size + 2 * h2:x_size + 3 * h2, Kx + K:].set(w2w)
    b2a = jnp.concatenate([-b2m, b2s, b2w], axis=1)                 # (1, Kx+2K)

    # Group-sum per component: (diff*diff) @ G -> (N, K)
    G = jnp.repeat(jnp.eye(K, dtype=jnp.float32), x_size, axis=0)   # (Kx, K)
    return w1a, b1a, floor1, w2a, b2a, G


def _pick_tile_and_vmem():
    """Generation-aware defaults: bigger tiles on 128-MiB-VMEM parts (v5e/v6e)."""
    try:
        vmem_cap = pltpu.get_tpu_info().vmem_capacity_bytes
    except Exception:
        vmem_cap = 64 * 1024 * 1024
    if vmem_cap >= 128 * 1024 * 1024:       # v5e / v6e
        return 8192, 64 * 1024 * 1024
    return 4096, 32 * 1024 * 1024           # v7x (64 MiB physical VMEM)


# --------------------------------------------------------------------------- #
# Wrapper
# --------------------------------------------------------------------------- #
def mgk_cond_ee_forward(x, y, params, *, K, tile_n=None):
    """MultiGaussKernelCondEE.forward(x, y) as a single Pallas TPU kernel call."""
    n, x_size = x.shape
    n_y, d = y.shape
    assert n_y == n
    logC = -d / 2.0 * math.log(2.0 * math.pi)

    w1a, b1a, floor1, w2a, b2a, G = fuse_params(params, x_size=x_size, K=K)
    xy = jnp.concatenate([x.astype(jnp.float32), y.astype(jnp.float32)], axis=1)

    default_tile, vmem_limit = _pick_tile_and_vmem()
    if tile_n is None:
        tile_n = default_tile
    if tile_n >= n:
        tile_n = n                           # single full-batch tile (always legal)
    else:
        tile_n = max(8, (tile_n // 8) * 8)   # sublane multiple for streamed f32 tiles
    num_tiles = pl.cdiv(n, tile_n)

    kernel = _make_kernel(n_rows=n, tile_n=tile_n, K=K, x_size=x_size, d=d)

    def resident(arr):                       # full-shape block, VMEM-resident
        return pl.BlockSpec(arr.shape, lambda i: (0, 0))

    out = pl.pallas_call(
        kernel,
        out_shape=jax.ShapeDtypeStruct((num_tiles * 8, 128), jnp.float32),
        grid=(num_tiles,),
        in_specs=[
            pl.BlockSpec((tile_n, x_size + d), lambda i: (i, 0)),   # streamed batch
            resident(w1a), resident(b1a), resident(floor1),
            resident(w2a), resident(b2a), resident(G),
        ],
        out_specs=pl.BlockSpec((8, 128), lambda i: (i, 0)),         # per-tile partial
        compiler_params=pltpu.CompilerParams(
            dimension_semantics=("parallel",),   # tiles are independent -> megacore OK
            vmem_limit_bytes=vmem_limit,
        ),
    )(xy, w1a, b1a, floor1, w2a, b2a, G)

    partials = out[::8, 0]                   # one scalar per tile
    return -logC - jnp.sum(partials) / n


# --------------------------------------------------------------------------- #
# Params + pure-JAX reference (faithful to the PyTorch module)
# --------------------------------------------------------------------------- #
def make_params(key, x_size, y_size, K):
    """PyTorch nn.Linear-style init; weights stored (in, out), biases (1, out)."""
    d = y_size
    h = 2 * d

    def linear(kw, kb, fan_in, fan_out):
        bound = 1.0 / math.sqrt(fan_in)
        w = jax.random.uniform(kw, (fan_in, fan_out), jnp.float32, -bound, bound)
        b = jax.random.uniform(kb, (1, fan_out), jnp.float32, -bound, bound)
        return w, b

    ks = jax.random.split(key, 12)

    def ff(k, out_dim):
        w1, b1 = linear(k[0], k[1], d, h)
        w2, b2 = linear(k[2], k[3], h, out_dim)
        return (w1, b1, w2, b2)

    p_mean = ff(ks[0:4], K * x_size)      # mean_weight: d -> 2d -> K*x_size
    p_std = ff(ks[4:8], K)                # std:         d -> 2d -> K
    p_w = ff(ks[8:12], K)                 # weight:      d -> 2d -> K
    return (p_mean, p_std, p_w)


def _ff_ref(p, inp):
    w1, b1, w2, b2 = p
    hi = jax.lax.Precision.HIGHEST
    h = jnp.maximum(jnp.dot(inp, w1, precision=hi) + b1, 0.0)
    return jnp.dot(h, w2, precision=hi) + b2


def mgk_cond_ee_forward_ref(x, y, params, *, K):
    p_mean, p_std, p_w = params
    n, x_size = x.shape
    d = y.shape[-1]
    logC = -d / 2.0 * math.log(2.0 * math.pi)

    wl = _ff_ref(p_w, y)                                    # (N, K)
    wmax = jnp.max(wl, axis=-1, keepdims=True)
    logw = wl - wmax - jnp.log(jnp.sum(jnp.exp(wl - wmax), axis=-1, keepdims=True))

    std = jnp.exp(_ff_ref(p_std, y))                        # (N, K)
    mu = _ff_ref(p_mean, y).reshape(n, K, x_size)           # (N, K, x_size)

    diff = x[:, None, :] - mu
    q = std ** 2 * jnp.sum(diff ** 2, axis=2)               # (N, K)
    q = -q / 2.0 + d * jnp.log(jnp.abs(std)) + logw
    qmax = jnp.max(q, axis=-1)
    lse = qmax + jnp.log(jnp.sum(jnp.exp(q - qmax[:, None]), axis=-1))
    return jnp.mean(-(logC + lse))


if __name__ == "__main__":
    # Small shapes implied by the module: batch N=32, x_size=8, y_size=d=8,
    # K (number_of_samples) = 16, layers=1  (hidden = 2*d = 16, K*x_size = 128).
    N, x_size, y_size, K = 32, 8, 8, 16

    key = jax.random.PRNGKey(0)
    kx, ky, kp = jax.random.split(key, 3)
    x = jax.random.normal(kx, (N, x_size), jnp.float32)
    y = jax.random.normal(ky, (N, y_size), jnp.float32)
    params = make_params(kp, x_size, y_size, K)

    ref = mgk_cond_ee_forward_ref(x, y, params, K=K)
    out = jax.block_until_ready(mgk_cond_ee_forward(x, y, params, K=K))  # single tile
    assert jnp.allclose(out, ref, rtol=1e-3, atol=1e-3), (out, ref)

    # Exercise the streamed multi-tile + ragged-last-tile path (N not a tile multiple).
    N2 = 200
    kx2, ky2 = jax.random.split(jax.random.PRNGKey(1))
    x2 = jax.random.normal(kx2, (N2, x_size), jnp.float32)
    y2 = jax.random.normal(ky2, (N2, y_size), jnp.float32)
    ref2 = mgk_cond_ee_forward_ref(x2, y2, params, K=K)
    out2 = jax.block_until_ready(mgk_cond_ee_forward(x2, y2, params, K=K, tile_n=64))
    assert jnp.allclose(out2, ref2, rtol=1e-3, atol=1e-3), (out2, ref2)

    print("KERNEL_OK")
</pallas_src>

<mosaic_0001>
module attributes {stable_mosaic.version = 11 : i64} {
  func.func @kernel(%arg0: i32, %arg1: memref<32x16xf32, #tpu.memory_space<vmem>>, %arg2: memref<16x56xf32, #tpu.memory_space<vmem>>, %arg3: memref<1x56xf32, #tpu.memory_space<vmem>>, %arg4: memref<1x56xf32, #tpu.memory_space<vmem>>, %arg5: memref<56x160xf32, #tpu.memory_space<vmem>>, %arg6: memref<1x160xf32, #tpu.memory_space<vmem>>, %arg7: memref<128x16xf32, #tpu.memory_space<vmem>>, %arg8: memref<8x128xf32, #tpu.memory_space<vmem>>) attributes {dimension_semantics = [#tpu.dimension_semantics<parallel>], iteration_bounds = array<i64: 1>, scalar_prefetch = 0 : i64, scratch_operands = 0 : i64, tpu.core_type = #tpu.core_type<tc>, window_params = [{transform_indices = @transform_0, window_bounds = array<i64: 32, 16>}, {pipeline_mode = #tpu.pipeline_mode<synchronous>, transform_indices = @transform_1, window_bounds = array<i64: 16, 56>}, {pipeline_mode = #tpu.pipeline_mode<synchronous>, transform_indices = @transform_2, window_bounds = array<i64: 1, 56>}, {pipeline_mode = #tpu.pipeline_mode<synchronous>, transform_indices = @transform_3, window_bounds = array<i64: 1, 56>}, {pipeline_mode = #tpu.pipeline_mode<synchronous>, transform_indices = @transform_4, window_bounds = array<i64: 56, 160>}, {pipeline_mode = #tpu.pipeline_mode<synchronous>, transform_indices = @transform_5, window_bounds = array<i64: 1, 160>}, {pipeline_mode = #tpu.pipeline_mode<synchronous>, transform_indices = @transform_6, window_bounds = array<i64: 128, 16>}, {transform_indices = @transform_7, window_bounds = array<i64: 8, 128>}]} {
    %c0 = arith.constant 0 : index
    %c0_0 = arith.constant 0 : index
    %0 = vector.load %arg1[%c0, %c0_0] : memref<32x16xf32, #tpu.memory_space<vmem>>, vector<32x16xf32>
    %c0_1 = arith.constant 0 : index
    %c0_2 = arith.constant 0 : index
    %1 = vector.load %arg2[%c0_1, %c0_2] : memref<16x56xf32, #tpu.memory_space<vmem>>, vector<16x56xf32>
    %cst = arith.constant dense<0.000000e+00> : vector<32x56xf32>
    %2 = tpu.matmul %0, %1, %cst {dimension_numbers = #tpu.dot_dimension_numbers<[1], [0], [0], [1], [0, 0, 1, 1], [], []>} : vector<32x16xf32>, vector<16x56xf32>, vector<32x56xf32> -> vector<32x56xf32>
    %c0_3 = arith.constant 0 : index
    %c0_4 = arith.constant 0 : index
    %3 = vector.load %arg3[%c0_3, %c0_4] : memref<1x56xf32, #tpu.memory_space<vmem>>, vector<1x56xf32>
    %4 = vector.broadcast %3 : vector<1x56xf32> to vector<32x56xf32>
    %5 = arith.addf %2, %4 : vector<32x56xf32>
    %c0_5 = arith.constant 0 : index
    %c0_6 = arith.constant 0 : index
    %6 = vector.load %arg4[%c0_5, %c0_6] : memref<1x56xf32, #tpu.memory_space<vmem>>, vector<1x56xf32>
    %7 = vector.broadcast %6 : vector<1x56xf32> to vector<32x56xf32>
    %8 = arith.maximumf %5, %7 : vector<32x56xf32>
    %c0_7 = arith.constant 0 : index
    %c0_8 = arith.constant 0 : index
    %9 = vector.load %arg5[%c0_7, %c0_8] : memref<56x160xf32, #tpu.memory_space<vmem>>, vector<56x160xf32>
    %cst_9 = arith.constant dense<0.000000e+00> : vector<32x160xf32>
    %10 = tpu.matmul %8, %9, %cst_9 {dimension_numbers = #tpu.dot_dimension_numbers<[1], [0], [0], [1], [0, 0, 1, 1], [], []>} : vector<32x56xf32>, vector<56x160xf32>, vector<32x160xf32> -> vector<32x160xf32>
    %c0_10 = arith.constant 0 : index
    %c0_11 = arith.constant 0 : index
    %11 = vector.load %arg6[%c0_10, %c0_11] : memref<1x160xf32, #tpu.memory_space<vmem>>, vector<1x160xf32>
    %12 = vector.broadcast %11 : vector<1x160xf32> to vector<32x160xf32>
    %13 = arith.addf %10, %12 : vector<32x160xf32>
    %14 = vector.extract_strided_slice %13 {offsets = [0, 0], sizes = [32, 128], strides = [1, 1]} : vector<32x160xf32> to vector<32x128xf32>
    %15 = vector.extract_strided_slice %13 {offsets = [0, 128], sizes = [32, 16], strides = [1, 1]} : vector<32x160xf32> to vector<32x16xf32>
    %16 = vector.extract_strided_slice %13 {offsets = [0, 144], sizes = [32, 16], strides = [1, 1]} : vector<32x160xf32> to vector<32x16xf32>
    %17 = arith.mulf %14, %14 : vector<32x128xf32>
    %c0_12 = arith.constant 0 : index
    %c0_13 = arith.constant 0 : index
    %18 = vector.load %arg7[%c0_12, %c0_13] : memref<128x16xf32, #tpu.memory_space<vmem>>, vector<128x16xf32>
    %cst_14 = arith.constant dense<0.000000e+00> : vector<32x16xf32>
    %19 = tpu.matmul %17, %18, %cst_14 {dimension_numbers = #tpu.dot_dimension_numbers<[1], [0], [0], [1], [0, 0, 1, 1], [], []>} : vector<32x128xf32>, vector<128x16xf32>, vector<32x16xf32> -> vector<32x16xf32>
    %cst_15 = arith.constant 2.000000e+00 : f32
    %20 = vector.broadcast %cst_15 : f32 to vector<32x16xf32>
    %21 = arith.mulf %20, %15 : vector<32x16xf32>
    %22 = math.exp %21 : vector<32x16xf32>
    %cst_16 = arith.constant -5.000000e-01 : f32
    %23 = vector.broadcast %cst_16 : f32 to vector<32x16xf32>
    %24 = arith.mulf %23, %22 : vector<32x16xf32>
    %25 = arith.mulf %24, %19 : vector<32x16xf32>
    %cst_17 = arith.constant 8.000000e+00 : f32
    %26 = vector.broadcast %cst_17 : f32 to vector<32x16xf32>
    %27 = arith.mulf %26, %15 : vector<32x16xf32>
    %28 = arith.addf %25, %27 : vector<32x16xf32>
    %29 = arith.addf %28, %16 : vector<32x16xf32>
    %30 = tpu.iota {dimensions = array<i32: 0>} : vector<32x16xi32>
    %c32_i32 = arith.constant 32 : i32
    %31 = arith.muli %arg0, %c32_i32 : i32
    %32 = vector.broadcast %31 : i32 to vector<32x16xi32>
    %33 = arith.addi %32, %30 : vector<32x16xi32>
    %c32_i32_18 = arith.constant 32 : i32
    %34 = vector.broadcast %c32_i32_18 : i32 to vector<32x16xi32>
    %35 = arith.cmpi slt, %33, %34 : vector<32x16xi32>
    %cst_19 = arith.constant 0.000000e+00 : f32
    %36 = vector.broadcast %cst_19 : f32 to vector<32x16xf32>
    %37 = arith.select %35, %29, %36 : vector<32x16xi1>, vector<32x16xf32>
    %cst_20 = arith.constant 0.000000e+00 : f32
    %38 = vector.broadcast %cst_20 : f32 to vector<32x16xf32>
    %39 = arith.select %35, %16, %38 : vector<32x16xi1>, vector<32x16xf32>
    %cst_21 = arith.constant dense<0xFF800000> : vector<32xf32>
    %40 = vector.multi_reduction <maximumf>, %37, %cst_21 [1] : vector<32x16xf32> to vector<32xf32>
    %41 = vector.shape_cast %40 : vector<32xf32> to vector<32x1xf32>
    %42 = vector.broadcast %41 : vector<32x1xf32> to vector<32x16xf32>
    %43 = arith.subf %37, %42 : vector<32x16xf32>
    %44 = math.exp %43 : vector<32x16xf32>
    %cst_22 = arith.constant dense<0.000000e+00> : vector<32xf32>
    %45 = vector.multi_reduction <add>, %44, %cst_22 [1] : vector<32x16xf32> to vector<32xf32>
    %46 = vector.shape_cast %45 : vector<32xf32> to vector<32x1xf32>
    %47 = math.log %46 : vector<32x1xf32>
    %48 = arith.addf %41, %47 : vector<32x1xf32>
    %cst_23 = arith.constant dense<0xFF800000> : vector<32xf32>
    %49 = vector.multi_reduction <maximumf>, %39, %cst_23 [1] : vector<32x16xf32> to vector<32xf32>
    %50 = vector.shape_cast %49 : vector<32xf32> to vector<32x1xf32>
    %51 = vector.broadcast %50 : vector<32x1xf32> to vector<32x16xf32>
    %52 = arith.subf %39, %51 : vector<32x16xf32>
    %53 = math.exp %52 : vector<32x16xf32>
    %cst_24 = arith.constant dense<0.000000e+00> : vector<32xf32>
    %54 = vector.multi_reduction <add>, %53, %cst_24 [1] : vector<32x16xf32> to vector<32xf32>
    %55 = vector.shape_cast %54 : vector<32xf32> to vector<32x1xf32>
    %56 = math.log %55 : vector<32x1xf32>
    %57 = arith.addf %50, %56 : vector<32x1xf32>
    %58 = arith.subf %48, %57 : vector<32x1xf32>
    %cst_25 = arith.constant dense<0.000000e+00> : vector<1xf32>
    %59 = vector.multi_reduction <add>, %58, %cst_25 [0] : vector<32x1xf32> to vector<1xf32>
    %60 = vector.shape_cast %59 : vector<1xf32> to vector<1x1xf32>
    %cst_26 = arith.constant 0.000000e+00 : f32
    %61 = vector.broadcast %cst_26 : f32 to vector<8x128xf32>
    %62 = vector.broadcast %60 : vector<1x1xf32> to vector<8x128xf32>
    %63 = arith.addf %61, %62 : vector<8x128xf32>
    %c0_27 = arith.constant 0 : index
    %c0_28 = arith.constant 0 : index
    %64 = vector.load %arg8[%c0_27, %c0_28] : memref<8x128xf32, #tpu.memory_space<vmem>>, vector<8x128xf32>
    tpu.vector_store %arg8[%c0_27, %c0_28], %63 {strides = array<i32>} : memref<8x128xf32, #tpu.memory_space<vmem>>, vector<8x128xf32>,
    return
  }
  func.func @transform_0(%arg0: i32) -> (i32, i32) {
    %c0_i32 = arith.constant 0 : i32
    %c0_i32_0 = arith.constant 0 : i32
    return %arg0, %c0_i32 : i32, i32
  }
  func.func @transform_1(%arg0: i32) -> (i32, i32) {
    %c0_i32 = arith.constant 0 : i32
    %c0_i32_0 = arith.constant 0 : i32
    %c0_i32_1 = arith.constant 0 : i32
    return %c0_i32, %c0_i32_0 : i32, i32
  }
  func.func @transform_2(%arg0: i32) -> (i32, i32) {
    %c0_i32 = arith.constant 0 : i32
    %c0_i32_0 = arith.constant 0 : i32
    %c0_i32_1 = arith.constant 0 : i32
    return %c0_i32, %c0_i32_0 : i32, i32
  }
  func.func @transform_3(%arg0: i32) -> (i32, i32) {
    %c0_i32 = arith.constant 0 : i32
    %c0_i32_0 = arith.constant 0 : i32
    %c0_i32_1 = arith.constant 0 : i32
    return %c0_i32, %c0_i32_0 : i32, i32
  }
  func.func @transform_4(%arg0: i32) -> (i32, i32) {
    %c0_i32 = arith.constant 0 : i32
    %c0_i32_0 = arith.constant 0 : i32
    %c0_i32_1 = arith.constant 0 : i32
    return %c0_i32, %c0_i32_0 : i32, i32
  }
  func.func @transform_5(%arg0: i32) -> (i32, i32) {
    %c0_i32 = arith.constant 0 : i32
    %c0_i32_0 = arith.constant 0 : i32
    %c0_i32_1 = arith.constant 0 : i32
    return %c0_i32, %c0_i32_0 : i32, i32
  }
  func.func @transform_6(%arg0: i32) -> (i32, i32) {
    %c0_i32 = arith.constant 0 : i32
    %c0_i32_0 = arith.constant 0 : i32
    %c0_i32_1 = arith.constant 0 : i32
    return %c0_i32, %c0_i32_0 : i32, i32
  }
  func.func @transform_7(%arg0: i32) -> (i32, i32) {
    %c0_i32 = arith.constant 0 : i32
    %c0_i32_0 = arith.constant 0 : i32
    return %arg0, %c0_i32 : i32, i32
  }
}

</mosaic_0001>

<bundles_post_ra>
// kernel: tpu_custom_call.1
= control target key start
LH: loop header
LB: loop body
LE: loop exit
PB: predicated region body
PF: predicated region fallthrough
CT: control target
= control target key end

     0   :  { %vm40_vm0 = vcmask 130048   ;;  %s980_s0 = inlined_call_operand.vmem [shape: f32[32,16], index: 0, kind: input, shape index: {}]   ;;  %s981_s1 = inlined_call_operand.vmem [shape: f32[16,56], index: 1, kind: input, shape index: {}]   ;;  %s982_s2 = inlined_call_operand.vmem [shape: f32[1,56], index: 2, kind: input, shape index: {}]   ;;  %s983_s3 = inlined_call_operand.vmem [shape: f32[1,56], index: 3, kind: input, shape index: {}]   ;;  %s984_s4 = inlined_call_operand.vmem [shape: f32[56,160], index: 4, kind: input, shape index: {}]   ;;  %s985_s5 = inlined_call_operand.vmem [shape: f32[1,160], index: 5, kind: input, shape index: {}]   ;;  %s986_s6 = inlined_call_operand.vmem [shape: f32[128,16], index: 6, kind: input, shape index: {}]   ;;  %s987_s7 = inlined_call_operand.hbm [shape: f32[8,128], index: 7, kind: output, shape index: {}]  }
   0x1   :  { %v32_v0 = vld [vmem:[%s981_s1 + $0x8] sm:$0xff]  ;;  %v31_v1 = vld [vmem:[%s981_s1] sm:$0xff]  ;;  %v29_v5 = vld [vmem:[%s980_s0 + $0x10] sm:$0xff] }
   0x2   :  { %v27_v2 = vld [vmem:[%s980_s0] sm:$0xff]  ;;  %631 = vmatprep.subr.mxu1 %v32_v0  ;;  %v28_v3 = vld [vmem:[%s980_s0 + $0x8] sm:$0xff]  ;;  %v160_v7 = vld [vmem:[%s984_s4 + $0x58] sm:$0xff] }
   0x3   :  { %635 = vmatprep.mubr.msk.f32.mxu1 %vm40_vm0, %v27_v2  ;;  %632 = vmatpush3.msra.mxu1 %v32_v0  ;;  %v162_v4 = vld [vmem:[%s984_s4 + $0x68] sm:$0xff]  ;;  %v161_v6 = vld [vmem:[%s984_s4 + $0x60] sm:$0xff] }
   0x4   :  { %633 = vmatprep.subr.mxu1 %v31_v1 }
   0x5   :  { %634 = vmatpush3.msra.mxu1 %v31_v1 }
   0x6   :  { %12 = vsyncpa [#allocation3], 0  ;;  %636 = vmatmul.mubr.msk.f32.vlgmr.msra.gmra.mxu1 %vm40_vm0, %v28_v3  ;;  %206 = vmatprep.subr.mxu1 %v162_v4  ;;  %v159_v8 = vld [vmem:[%s984_s4 + $0x50] sm:$0xff]  ;;  %v30_v9 = vld [vmem:[%s980_s0 + $0x18] sm:$0xff]  ;;  %v744_v20 = vmov 0.0   ;;  %vm175_vm1 = vcmask 457728   ;;  %v165_v51 = vlaneseq }
   0x7   :  { %638 = vmatprep.mubr.msk.f32.mxu1 %vm40_vm0, %v29_v5  ;;  %207 = vmatpush1.msra.mxu1 %v161_v6  ;;  %v158_v10 = vld [vmem:[%s984_s4 + $0x48] sm:$0xff]  ;;  %v157_v11 = vld [vmem:[%s984_s4 + $0x40] sm:$0xff]  ;;  %v156_v12 = vld [vmem:[%s984_s4 + $0x38] sm:$0xff]  ;;  %vm501_vm2 = vcmask 261248  }
   0x8   :  { %208 = vmatprep.subr.mxu1 %v160_v7  ;;  %v155_v13 = vld [vmem:[%s984_s4 + $0x30] sm:$0xff]  ;;  %v154_v14 = vld [vmem:[%s984_s4 + $0x28] sm:$0xff]  ;;  %v153_v15 = vld [vmem:[%s984_s4 + $0x20] sm:$0xff]  ;;  %v166_v52 = vshrl.u32 %v165_v51, 7 }
   0x9   :  { %209 = vmatpush1.msra.mxu1 %v159_v8  ;;  %v152_v16 = vld [vmem:[%s984_s4 + $0x18] sm:$0xff]  ;;  %v151_v17 = vld [vmem:[%s984_s4 + $0x10] sm:$0xff]  ;;  %v150_v18 = vld [vmem:[%s984_s4 + $0x8] sm:$0xff] }
   0xa   :  { %639 = vmatmul.mubr.msk.f32.gmra.mxu1 %vm40_vm0, %v30_v9  ;;  %210 = vmatprep.subr.mxu1 %v158_v10  ;;  %v149_v19 = vld [vmem:[%s984_s4] sm:$0xff]  ;;  %v296_v21 = vld [vmem:[%s986_s6 + $0x78] sm:$0xff]  ;;  %v295_v22 = vld [vmem:[%s986_s6 + $0x70] sm:$0xff]  ;;  %v167_v53 = vsub.s32 0, %v166_v52  ;;  %v171_v55 = vsub.s32 1, %v166_v52 }
   0xb   :  { %211 = vmatpush1.msra.mxu1 %v157_v11  ;;  %252 = vmatprep.mubr.f32.mxu1 %v744_v20  ;;  %v294_v23 = vld [vmem:[%s986_s6 + $0x68] sm:$0xff]  ;;  %v293_v24 = vld [vmem:[%s986_s6 + $0x60] sm:$0xff]  ;;  %v292_v25 = vld [vmem:[%s986_s6 + $0x58] sm:$0xff] }
   0xc   :  { %212 = vmatprep.subr.mxu1 %v156_v12  ;;  %641 = vmatprep.subr.mxu0 %v296_v21  ;;  %v291_v26 = vld [vmem:[%s986_s6 + $0x50] sm:$0xff]  ;;  %v290_v27 = vld [vmem:[%s986_s6 + $0x48] sm:$0xff]  ;;  %v289_v28 = vld [vmem:[%s986_s6 + $0x40] sm:$0xff] }
   0xd   :  { %213 = vmatpush1.msra.mxu1 %v155_v13  ;;  %642 = vmatpush3.msra.mxu0 %v296_v21  ;;  %v288_v29 = vld [vmem:[%s986_s6 + $0x38] sm:$0xff]  ;;  %v287_v30 = vld [vmem:[%s986_s6 + $0x30] sm:$0xff]  ;;  %v286_v31 = vld [vmem:[%s986_s6 + $0x28] sm:$0xff] }
   0xe   :  { %214 = vmatprep.subr.mxu1 %v154_v14  ;;  %643 = vmatprep.subr.mxu0 %v295_v22  ;;  %v285_v32 = vld [vmem:[%s986_s6 + $0x20] sm:$0xff]  ;;  %v284_v47 = vld [vmem:[%s986_s6 + $0x18] sm:$0xff]  ;;  %v283_v48 = vld [vmem:[%s986_s6 + $0x10] sm:$0xff] }
   0xf   :  { %215 = vmatpush1.msra.mxu1 %v153_v15  ;;  %644 = vmatpush3.msra.mxu0 %v295_v22  ;;  %v595_v34 = vld [vmem:[%s982_s2] ss:$0 sm:$0xff]  ;;  %v282_v49 = vld [vmem:[%s986_s6 + $0x8] sm:$0xff] }
  0x10   :  { %216 = vmatprep.subr.mxu1 %v152_v16  ;;  %645 = vmatprep.subr.mxu0 %v294_v23  ;;  %v600_v37 = vld [vmem:[%s983_s3] ss:$0 sm:$0xff] }
  0x11   :  { %217 = vmatpush1.msra.mxu1 %v151_v17  ;;  %646 = vmatpush3.msra.mxu0 %v294_v23  ;;  %v281_v50 = vld [vmem:[%s986_s6] sm:$0xff]  ;;  %s745_s6 = smov 112  }
  0x12   :  { %218 = vmatprep.subr.mxu1 %v150_v18  ;;  %647 = vmatprep.subr.mxu0 %v293_v24  ;;  %v163_v54 = vld [vmem:[%s985_s5] sm:$0x3]  ;;  %s746_s5 = smov [#allocation2]  }
  0x13   :  { %219 = vmatpush1.msra.mxu1 %v149_v19  ;;  %648 = vmatpush3.msra.mxu0 %v293_v24  ;;  %v168_v56 = vrot.slane %v163_v54, %v167_v53  ;;  %v172_v57 = vrot.slane %v163_v54, %v171_v55  ;;  %s587_s24 = sshll.u32 %s746_s5, 4  ;;  %s588_s24 = int_to_ptr.vmem [resolvable:$true] %s587_s24 }
  0x14   :  { %649 = vmatprep.subr.mxu0 %v292_v25  ;;  %s722_s25 = scalar_lea.vmem %s588_s24, 128  ;;  %p727_p1 = scmp.lt.s32.totalorder %s588_s24, %s588_s24 }
  0x15   :  { %650 = vmatpush3.msra.mxu0 %v292_v25  ;;  %p723_p0 = scmp.ne.s32.totalorder %s588_s24, %s722_s25  ;;  %p728_p2 = scmp.lt.s32.totalorder %s722_s25, %s722_s25 }
  0x16   :  { %651 = vmatprep.subr.mxu0 %v291_v26 }
  0x17   :  { %652 = vmatpush3.msra.mxu0 %v291_v26  ;;  %p729_p3 = por %p728_p2, %p727_p1 }
  0x18   :  { %653 = vmatprep.subr.mxu0 %v290_v27 }
  0x19   :  { %654 = vmatpush3.msra.mxu0 %v290_v27  ;;  %p730_p4 = pnand %p729_p3, %p723_p0 }
  0x1a   :  { %655 = vmatprep.subr.mxu0 %v289_v28 }
  0x1b   :  { %656 = vmatpush3.msra.mxu0 %v289_v28 }
  0x1c   :  { %657 = vmatprep.subr.mxu0 %v288_v29 }
  0x1d   :  { %658 = vmatpush3.msra.mxu0 %v288_v29 }
  0x1e   :  { %659 = vmatprep.subr.mxu0 %v287_v30 }
  0x1f   :  { %660 = vmatpush3.msra.mxu0 %v287_v30 }
  0x20   :  { %661 = vmatprep.subr.mxu0 %v286_v31 }
  0x21   :  { %662 = vmatpush3.msra.mxu0 %v286_v31 }
  0x22   :  { %663 = vmatprep.subr.mxu0 %v285_v32 }
  0x23   :  { %664 = vmatpush3.msra.mxu0 %v285_v32 }
  0x24   :  { %665 = vmatprep.subr.mxu0 %v284_v47 }
  0x25   :  { %666 = vmatpush3.msra.mxu0 %v284_v47 }
  0x26   :  { %667 = vmatprep.subr.mxu0 %v283_v48 }
  0x27   :  { %668 = vmatpush3.msra.mxu0 %v283_v48 }
  0x28   :  { %669 = vmatprep.subr.mxu0 %v282_v49 }
  0x29   :  { %670 = vmatpush3.msra.mxu0 %v282_v49 }
  0x2a   :  { %671 = vmatprep.subr.mxu0 %v281_v50 }
  0x2b   :  { %672 = vmatpush3.msra.mxu0 %v281_v50 }
  0xc6   :  { %v637_v33 = vpop.f32.mrf.mxu1 }
  0xc7   :  { %v125_v39 = vadd.f32 %v637_v33, %v595_v34 }
  0xc8   :  { %v119_v35 = vpop.f32.mrf.mxu1 }
  0xc9   :  { %v120_v36 = vadd.f32 %v595_v34, %v119_v35  ;;  %v146_v42 = vmax.f32 %v125_v39, %v600_v37 }
  0xca   :  { %v640_v38 = vpop.f32.mrf.mxu1 }
  0xcb   :  { %v145_v40 = vmax.f32 %v120_v36, %v600_v37  ;;  %v135_v44 = vadd.f32 %v640_v38, %v595_v34 }
  0xcc   :  { %v129_v41 = vpop.f32.mrf.mxu1 }
  0xcd   :  { %601 = vmatmul.mubr.msk.f32.vlgmr.msra.gmra.mxu1 %vm175_vm1, %v145_v40  ;;  %v130_v43 = vadd.f32 %v595_v34, %v129_v41  ;;  %v148_v46 = vmax.f32 %v135_v44, %v600_v37 }
  0xce   :  { %258 = vmatprep.mubr.f32.mxu1 %v744_v20 }
  0xcf   :  { %v147_v45 = vmax.f32 %v130_v43, %v600_v37 }
  0xd1   :  { %602 = vmatmul.mubr.msk.f32.gmra.mxu1 %vm175_vm1, %v146_v42 }
  0xd2   :  { %264 = vmatprep.mubr.f32.mxu1 %v744_v20 }
  0xd5   :  { %603 = vmatmul.mubr.msk.f32.gmra.mxu1 %vm175_vm1, %v147_v45 }
  0xd6   :  { %270 = vmatprep.mubr.f32.mxu1 %v744_v20 }
  0xd9   :  { %604 = vmatmul.mubr.msk.f32.gmra.mxu1 %vm175_vm1, %v148_v46 }
 0x18d   :  { %v254_v58 = vpop.f32.mrf.mxu1 }
 0x18e   :  { %v255_v59 = vadd.f32 %v254_v58, %v168_v56 }
 0x18f   :  { %v256_v60 = vpop.f32.mrf.mxu1 }
 0x190   :  { %v908_v61 = vadd.f32 %v256_v60, %v172_v57  ;;  %v277_v62 = vmul.f32 %v255_v59, %v255_v59 }
 0x191   :  { %v260_v63 = vpop.f32.mrf.mxu1 }
 0x192   :  { %v261_v0 = vadd.f32 %v260_v63, %v168_v56  ;;  %414 = vrot.lane.b32.xlu0 %v908_v61, %s745_s6  ;;  %673 = vmatprep.mubr.f32.mxu0 %v277_v62  ;;  %v502_v1 = vsel %vm501_vm2, %v908_v61, -inf  ;;  %v382_v23 = vmul.f32 2.0, %v908_v61  ;;  %v402_v49 = vmul.f32 8.0, %v908_v61 }
 0x193   :  { %v262_v2 = vpop.f32.mrf.mxu1  ;;  %503 = vmax.xlane.f32.xlu1 %v502_v1 }
 0x194   :  { %v278_v3 = vmul.f32 %v261_v0, %v261_v0  ;;  %v914_v4 = vadd.f32 %v262_v2, %v172_v57  ;;  %v386_v25 = vmul.f32 1.442695, %v382_v23 }
 0x195   :  { %v266_v5 = vpop.f32.mrf.mxu1 }
 0x196   :  { %v267_v6 = vadd.f32 %v266_v5, %v168_v56  ;;  %416 = vrot.lane.b32.xlu0 %v914_v4, %s745_s6  ;;  %674 = vmatmul.mubr.f32.vlgmr.msra.gmra.mxu0 %v278_v3  ;;  %v505_v13 = vsel %vm501_vm2, %v914_v4, -inf  ;;  %v383_v22 = vmul.f32 2.0, %v914_v4  ;;  %v403_v42 = vmul.f32 8.0, %v914_v4 }
 0x197   :  { %v268_v7 = vpop.f32.mrf.mxu1 }
 0x198   :  { %v279_v8 = vmul.f32 %v267_v6, %v267_v6  ;;  %v918_v12 = vadd.f32 %v268_v7, %v172_v57  ;;  %v388_v24 = vmul.f32 1.442695, %v383_v22 }
 0x199   :  { %v272_v9 = vpop.f32.mrf.mxu1 }
 0x19a   :  { %v273_v10 = vadd.f32 %v272_v9, %v168_v56  ;;  %676 = vmatprep.mubr.f32.mxu0 %v279_v8  ;;  %v508_v16 = vsel %vm501_vm2, %v918_v12, -inf  ;;  %v384_v27 = vmul.f32 2.0, %v918_v12 }
 0x19b   :  { %v274_v14 = vpop.f32.mrf.mxu1 }
 0x19c   :  { %v280_v11 = vmul.f32 %v273_v10, %v273_v10  ;;  %v275_v15 = vadd.f32 %v274_v14, %v172_v57  ;;  %v390_v29 = vmul.f32 1.442695, %v384_v27 }
 0x19e   :  { %677 = vmatmul.mubr.f32.gmra.mxu0 %v280_v11  ;;  %v511_v17 = vsel %vm501_vm2, %v275_v15, -inf  ;;  %v385_v26 = vmul.f32 2.0, %v275_v15  ;;  %v405_v60 = vmul.f32 8.0, %v275_v15 }
 0x1a0   :  { %v392_v28 = vmul.f32 1.442695, %v385_v26 }
 0x1a4   :  { %418 = vrot.lane.b32.xlu1 %v918_v12, %s745_s6 }
 0x1b5   :  { %506 = vmax.xlane.f32.xlu0 %v505_v13 }
 0x1c8   :  { %509 = vmax.xlane.f32.xlu1 %v508_v16 }
 0x1cb   :  { %420 = vrot.lane.b32.xlu0 %v275_v15, %s745_s6 }
 0x1cc   :  { %512 = vmax.xlane.f32.xlu1 %v511_v17 }
 0x204   :  { %v415_v33 = vpop.permute.xlu0 %414 }
 0x208   :  { %v417_v44 = vpop.permute.xlu0 %416 }
 0x21c   :  { %v928_v18 = vpop.xlane.xlu1 %503 }
 0x21d   :  { %v514_v19 = vsub.f32 %v908_v61, %v928_v18  ;;  %v404_v61 = vmul.f32 8.0, %v918_v12 }
 0x21f   :  { %v518_v20 = vmul.f32 1.442695, %v514_v19 }
 0x220   :  { %v419_v30 = vpop.permute.xlu1 %418 }
 0x221   :  { %682 = vpow2.f32 %v518_v20 }
 0x222   :  { %684 = vpow2.f32 %v388_v24 }
 0x223   :  { %686 = vpow2.f32 %v386_v25 }
 0x224   :  { %688 = vpow2.f32 %v392_v28 }
 0x225   :  { %690 = vpow2.f32 %v390_v29 }
 0x22e   :  { %v683_v21 = vpop.eup %682 }
 0x22f   :  { %530 = vrot.lane.b32.xlu0 %v683_v21, %s745_s6  ;;  %v685_v32 = vpop.eup %684 }
 0x230   :  { %v687_v35 = vpop.eup %686  ;;  %v395_v38 = vmul.f32 -0.5, %v685_v32 }
 0x231   :  { %v394_v43 = vmul.f32 -0.5, %v687_v35  ;;  %v689_v50 = vpop.eup %688 }
 0x232   :  { %v691_v53 = vpop.eup %690  ;;  %v397_v56 = vmul.f32 -0.5, %v689_v50 }
 0x233   :  { %v396_v62 = vmul.f32 -0.5, %v691_v53 }
 0x23e   :  { %v945_v54 = vpop.xlane.xlu0 %506 }
 0x23f   :  { %v515_v8 = vsub.f32 %v914_v4, %v945_v54 }
 0x242   :  { %v421_v3 = vpop.permute.xlu0 %420 }
 0x251   :  { %v936_v31 = vpop.xlane.xlu1 %509 }
 0x252   :  { %v516_v34 = vsub.f32 %v918_v12, %v936_v31  ;;  %v520_v12 = vmul.f32 1.442695, %v515_v8 }
 0x254   :  { %v522_v36 = vmul.f32 1.442695, %v516_v34 }
 0x255   :  { %v940_v37 = vpop.xlane.xlu1 %512 }
 0x256   :  { %692 = vpow2.f32 %v522_v36  ;;  %v517_v39 = vsub.f32 %v275_v15, %v940_v37  ;;  %v675_v40 = vpop.f32.mrf.mxu0 }
 0x257   :  { %v399_v41 = vmul.f32 %v675_v40, %v395_v38 }
 0x258   :  { %v524_v45 = vmul.f32 1.442695, %v517_v39  ;;  %v363_v46 = vpop.f32.mrf.mxu0 }
 0x259   :  { %v407_v47 = vadd.f32 %v403_v42, %v399_v41  ;;  %v398_v48 = vmul.f32 %v394_v43, %v363_v46 }
 0x25a   :  { %694 = vpow2.f32 %v524_v45 }
 0x25b   :  { %v406_v51 = vadd.f32 %v402_v49, %v398_v48  ;;  %v427_v52 = vadd.f32 %v417_v44, %v407_v47  ;;  %696 = vpow2.f32 %v520_v12 }
 0x25d   :  { %v456_v55 = vsel %vm40_vm0, %v427_v52, -inf  ;;  %v426_v57 = vadd.f32 %v415_v33, %v406_v51 }
 0x25e   :  { %457 = vmax.xlane.f32.xlu1 %v456_v55  ;;  %v678_v58 = vpop.f32.mrf.mxu0 }
 0x25f   :  { %v401_v59 = vmul.f32 %v678_v58, %v397_v56  ;;  %v453_v2 = vsel %vm40_vm0, %v426_v57, -inf }
 0x260   :  { %v373_v63 = vpop.f32.mrf.mxu0 }
 0x261   :  { %v409_v0 = vadd.f32 %v405_v60, %v401_v59  ;;  %v400_v1 = vmul.f32 %v396_v62, %v373_v63 }
 0x262   :  { %454 = vmax.xlane.f32.xlu1 %v453_v2 }
 0x263   :  { %v693_v5 = vpop.eup %692  ;;  %v408_v6 = vadd.f32 %v404_v61, %v400_v1  ;;  %v429_v7 = vadd.f32 %v421_v3, %v409_v0 }
 0x264   :  { %534 = vrot.lane.b32.xlu0 %v693_v5, %s745_s6 }
 0x265   :  { %v462_v9 = vsel %vm40_vm0, %v429_v7, -inf  ;;  %v428_v10 = vadd.f32 %v419_v30, %v408_v6 }
 0x266   :  { %463 = vmax.xlane.f32.xlu1 %v462_v9 }
 0x267   :  { %v695_v11 = vpop.eup %694  ;;  %v459_v13 = vsel %vm40_vm0, %v428_v10, -inf }
 0x268   :  { %536 = vrot.lane.b32.xlu0 %v695_v11, %s745_s6  ;;  %v697_v14 = vpop.eup %696 }
 0x26a   :  { %460 = vmax.xlane.f32.xlu1 %v459_v13 }
 0x27b   :  { %532 = vrot.lane.b32.xlu1 %v697_v14, %s745_s6 }
 0x2a1   :  { %v531_v15 = vpop.permute.xlu0 %530 }
 0x2a2   :  { %v542_v16 = vsel %vm40_vm0, %v531_v15, 0.0 }
 0x2a3   :  { %543 = vadd.xlane.f32.xlu0 %v542_v16 }
 0x2d6   :  { %v535_v33 = vpop.permute.xlu0 %534 }
 0x2d7   :  { %v548_v35 = vsel %vm40_vm0, %v535_v33, 0.0 }
 0x2da   :  { %v537_v43 = vpop.permute.xlu0 %536 }
 0x2db   :  { %v551_v44 = vsel %vm40_vm0, %v537_v43, 0.0 }
 0x2e7   :  { %v958_v4 = vpop.xlane.xlu1 %457 }
 0x2e8   :  { %v466_v17 = vsub.f32 %v427_v52, %v958_v4 }
 0x2ea   :  { %v471_v19 = vmul.f32 1.442695, %v466_v17 }
 0x2eb   :  { %v455_v20 = vpop.xlane.xlu1 %454 }
 0x2ec   :  { %698 = vpow2.f32 %v471_v19  ;;  %v465_v21 = vsub.f32 %v426_v57, %v455_v20 }
 0x2ee   :  { %v469_v22 = vmul.f32 1.442695, %v465_v21 }
 0x2ef   :  { %v961_v23 = vpop.xlane.xlu1 %463 }
 0x2f0   :  { %700 = vpow2.f32 %v469_v22  ;;  %v468_v24 = vsub.f32 %v429_v7, %v961_v23 }
 0x2f2   :  { %v475_v25 = vmul.f32 1.442695, %v468_v24 }
 0x2f3   :  { %v461_v26 = vpop.xlane.xlu1 %460 }
 0x2f4   :  { %702 = vpow2.f32 %v475_v25  ;;  %v467_v27 = vsub.f32 %v428_v10, %v461_v26 }
 0x2f6   :  { %v473_v28 = vmul.f32 1.442695, %v467_v27 }
 0x2f7   :  { %v533_v29 = vpop.permute.xlu1 %532 }
 0x2f8   :  { %704 = vpow2.f32 %v473_v28  ;;  %v545_v30 = vsel %vm40_vm0, %v533_v29, 0.0 }
 0x2f9   :  { %v699_v32 = vpop.eup %698  ;;  %546 = vadd.xlane.f32.xlu0 %v545_v30 }
 0x2fa   :  { %v480_v34 = vsel %vm40_vm0, %v699_v32, 0.0 }
 0x2fb   :  { %481 = vadd.xlane.f32.xlu1 %v480_v34 }
 0x2fd   :  { %v701_v36 = vpop.eup %700  ;;  %549 = vadd.xlane.f32.xlu0 %v548_v35 }
 0x2fe   :  { %v477_v38 = vsel %vm40_vm0, %v701_v36, 0.0 }
 0x301   :  { %v703_v39 = vpop.eup %702  ;;  %478 = vadd.xlane.f32.xlu0 %v477_v38 }
 0x302   :  { %v486_v40 = vsel %vm40_vm0, %v703_v39, 0.0 }
 0x303   :  { %487 = vadd.xlane.f32.xlu1 %v486_v40 }
 0x305   :  { %v705_v41 = vpop.eup %704 }
 0x306   :  { %v483_v42 = vsel %vm40_vm0, %v705_v41, 0.0 }
 0x307   :  { %484 = vadd.xlane.f32.xlu0 %v483_v42 }
 0x30b   :  { %552 = vadd.xlane.f32.xlu0 %v551_v44 }
 0x32c   :  { %v544_v45 = vpop.xlane.xlu0 %543 }
 0x32d   :  { %706 = vlog2.f32 %v544_v45 }
 0x33a   :  { %v707_v53 = vpop.eup %706 }
 0x33b   :  { %v555_v60 = vmul.f32 0.6931472, %v707_v53 }
 0x33d   :  { %v562_v3 = vadd.f32 %v555_v60, %v928_v18 }
 0x382   :  { %v547_v46 = vpop.xlane.xlu0 %546 }
 0x384   :  { %v482_v48 = vpop.xlane.xlu1 %481 }
 0x385   :  { %708 = vlog2.f32 %v482_v48 }
 0x386   :  { %v550_v47 = vpop.xlane.xlu0 %549 }
 0x38a   :  { %v479_v49 = vpop.xlane.xlu0 %478 }
 0x38b   :  { %710 = vlog2.f32 %v479_v49 }
 0x38c   :  { %712 = vlog2.f32 %v547_v46  ;;  %v488_v50 = vpop.xlane.xlu1 %487 }
 0x38d   :  { %714 = vlog2.f32 %v550_v47 }
 0x38e   :  { %716 = vlog2.f32 %v488_v50 }
 0x390   :  { %v485_v51 = vpop.xlane.xlu0 %484 }
 0x391   :  { %718 = vlog2.f32 %v485_v51 }
 0x392   :  { %v709_v55 = vpop.eup %708 }
 0x393   :  { %v492_v62 = vmul.f32 0.6931472, %v709_v55 }
 0x394   :  { %v553_v52 = vpop.xlane.xlu0 %552 }
 0x395   :  { %720 = vlog2.f32 %v553_v52  ;;  %v498_v5 = vadd.f32 %v492_v62, %v958_v4 }
 0x398   :  { %v711_v56 = vpop.eup %710 }
 0x399   :  { %v713_v57 = vpop.eup %712  ;;  %v490_v58 = vmul.f32 0.6931472, %v711_v56 }
 0x39a   :  { %v715_v59 = vpop.eup %714  ;;  %v557_v63 = vmul.f32 0.6931472, %v713_v57 }
 0x39b   :  { %v717_v0 = vpop.eup %716  ;;  %v559_v1 = vmul.f32 0.6931472, %v715_v59  ;;  %v497_v61 = vadd.f32 %v490_v58, %v455_v20 }
 0x39c   :  { %v563_v7 = vadd.f32 %v557_v63, %v945_v54  ;;  %v496_v10 = vmul.f32 0.6931472, %v717_v0 }
 0x39d   :  { %v564_v8 = vadd.f32 %v559_v1, %v936_v31  ;;  %v566_v9 = vsub.f32 %v497_v61, %v562_v3 }
 0x39e   :  { %v719_v2 = vpop.eup %718  ;;  %v567_v13 = vsub.f32 %v498_v5, %v563_v7  ;;  %v500_v17 = vadd.f32 %v496_v10, %v961_v23 }
 0x39f   :  { %v494_v6 = vmul.f32 0.6931472, %v719_v2 }
 0x3a0   :  { %v570_v16 = vadd.f32 %v567_v13, %v566_v9 }
 0x3a1   :  { %v499_v11 = vadd.f32 %v494_v6, %v461_v26 }
 0x3a2   :  { %v721_v12 = vpop.eup %720 }
 0x3a3   :  { %v568_v14 = vsub.f32 %v499_v11, %v564_v8  ;;  %v561_v15 = vmul.f32 0.6931472, %v721_v12 }
 0x3a5   :  { %v565_v19 = vadd.f32 %v561_v15, %v940_v37  ;;  %v571_v18 = vadd.f32 %v570_v16, %v568_v14 }
 0x3a7   :  { %v569_v20 = vsub.f32 %v500_v17, %v565_v19 }
 0x3a9   :  { %v572_v4 = vadd.f32 %v571_v18, %v569_v20 }
 0x3ab   :  { %v573_v21 = vrot.slane %v572_v4, 4 }
 0x3ad   :  { %v574_v22 = vadd.f32 %v573_v21, %v572_v4 }
 0x3af   :  { %v575_v54 = vrot.slane %v574_v22, 2 }
 0x3b1   :  { %v576_v24 = vadd.f32 %v575_v54, %v574_v22 }
 0x3b3   :  { %v577_v31 = vrot.slane %v576_v24, 1 }
 0x3b5   :  { %v578_v25 = vadd.f32 %v577_v31, %v576_v24 }
 0x3b7   :  { %580 = vst [vmem:[#allocation2] sm:$0xff] %v578_v25 }
 0x3b8   :  { %733 = shalt.err (!%p730_p4)
}
 0x3b9   :  { %590 = dma.vmem_to_hbm [thread:$0]  %s588_s24, 128, %s987_s7, [#allocation3]  }
 0x3ba   :  { %742 = dma.done.wait [#allocation3], 128  }
 0x3bb   :  { %743 = vsyncadd [#allocation3], 4294967168 }
 0x3bc   :  { %594 = vsyncpa [#allocation3], 1 }

</bundles_post_ra>
